<compile_context>
chip_gen: v7x
topology: tpu7x:2x2x1
jax: 0.10.0
libtpu: 0.0.40
codegen_flags: <defaults>
</compile_context>

<pallas_src>
import functools

import jax
import jax.numpy as jnp
from jax import lax
from jax.experimental import pallas as pl
from jax.experimental.pallas import tpu as pltpu


def _round_up(a, b):
    return -(-a // b) * b


def _sublane_rows(itemsize):
    # rows per (sublane x lane) tile for the given dtype width: f32->8, bf16->16
    return 8 * max(1, 4 // int(itemsize))


def _vmem_limit_bytes():
    """Per-generation scoped-VMEM limit: ~75% of physical, capped at 96 MiB.
    v5e/v6e (128 MiB physical) -> 96 MiB; v7x (64 MiB physical) -> 48 MiB."""
    cap = None
    try:
        cap = getattr(pltpu.get_tpu_info(), "vmem_capacity_bytes", None)
    except Exception:
        cap = None
    if not cap:
        cap = 64 * 1024 * 1024  # conservative fallback = v7x physical VMEM
    return int(min(cap * 3 // 4, 96 * 1024 * 1024))


def _pick_lane_tile(L, bytes_per_lane, budget, *, outer=1, min_blocks=1,
                    max_tile=None):
    """Largest lane tile (multiple of 128, or == L if a whole row fits) such
    that the modeled resident VMEM footprint (bytes_per_lane * tile) stays
    under `budget`, optionally capped and kept split-able for v7x's 2 cores."""
    tile = max(128, (int(budget) // max(int(bytes_per_lane), 1)) // 128 * 128)
    if max_tile is not None:
        tile = min(tile, max(128, (int(max_tile) // 128) * 128))
    if L <= tile:
        tile = L  # single full-width block along L (full-dim rule)
    # keep at least `min_blocks` grid blocks so both v7x TensorCores get work
    while outer * pl.cdiv(L, tile) < min_blocks:
        nt = ((tile // 2) // 128) * 128
        if nt < 128:
            break
        tile = nt
    return tile


def _reduce_kernel(x_ref, psum_ref, acc_ref, *, rem):
    """Phase 1: per-(batch, channel) partial sum over lane tiles of L.

    Element-wise f32 accumulation every step (VALU, hidden under DMA); the
    single cross-lane reduce happens once at finalize.  `rem` != 0 means the
    last L-tile is ragged and its out-of-range lanes must be zeroed."""
    lt = pl.program_id(1)
    n_lt = pl.num_programs(1)

    x = x_ref[...].astype(jnp.float32)                      # (C, tile_L)
    if rem:  # static Python int: mask only when the last tile is ragged
        lane = lax.broadcasted_iota(jnp.int32, x.shape, 1)
        x = jnp.where((lt < n_lt - 1) | (lane < rem), x, 0.0)

    @pl.when(lt == 0)
    def _init():
        acc_ref[...] = jnp.zeros_like(acc_ref)

    acc_ref[...] += x

    @pl.when(lt == n_lt - 1)
    def _finalize():
        psum_ref[...] = jnp.sum(acc_ref[...], axis=1, keepdims=True)


def _subtract_kernel(x_ref, lo_ref, up_ref, shift_ref, x_out, lo_out, up_out):
    """Phase 2: broadcast-subtract of the (C, 1) shift (f32 compute)."""
    shift = shift_ref[...]                                  # (C, 1) f32
    x_out[...] = (x_ref[...].astype(jnp.float32) - shift).astype(x_out.dtype)
    lo_out[...] = (lo_ref[...].astype(jnp.float32) - shift).astype(lo_out.dtype)
    up_out[...] = (up_ref[...].astype(jnp.float32) - shift).astype(up_out.dtype)


@functools.partial(
    jax.jit,
    static_argnames=("momentum", "training", "affine", "max_lane_tile"))
def mean_shift_forward(x, lower, upper, running_mean, bias, *,
                       momentum=0.01, training=True, affine=True,
                       max_lane_tile=None):
    """Pallas MeanShift.forward.  Returns ((x_c, lower_c, upper_c), new_running_mean)."""
    # TODO(synk): the PyTorch forward also accepts None for x/lower/upper
    # (apply_if_not_none); here all three tensors are assumed present.
    N, C, L = x.shape
    dtype = x.dtype
    itemsize = jnp.dtype(dtype).itemsize

    rm_f32 = running_mean.astype(jnp.float32)
    if bias is None or not affine:
        bias_f32 = jnp.zeros((C,), jnp.float32)
    else:
        bias_f32 = bias.astype(jnp.float32)

    vmem_limit = _vmem_limit_bytes()
    budget = int(vmem_limit * 0.7)
    c_pad_in = _round_up(C, _sublane_rows(itemsize))
    c_pad_f32 = _round_up(C, 8)
    # cap any single stream's block at ~2 MiB: well past the DMA-efficiency
    # knee, and keeps 12 resident phase-2 buffers safely inside every
    # generation's VMEM even if the capacity query is off.
    per_block_cap = max(128, ((2 * 1024 * 1024) // max(c_pad_f32 * 4, 1))
                        // 128 * 128)
    tile_cap = per_block_cap if max_lane_tile is None else min(per_block_cap,
                                                               max_lane_tile)

    # ---- phase 1 (training only): per-channel mean of x over (N, L) ---------
    if training:
        # resident bytes per lane: x double-buffered + the f32 accumulator
        bpl1 = 2 * c_pad_in * itemsize + c_pad_f32 * 4
        tile1 = _pick_lane_tile(L, bpl1, budget, outer=N, min_blocks=1,
                                max_tile=tile_cap)
        n_l1 = pl.cdiv(L, tile1)
        rem1 = L % tile1  # 0 when tile1 == L or tile1 divides L

        # TODO(synk): when N == 1 the phase-1 reduce runs on a single v7x core;
        # a leading size-2 parallel axis splitting the L tiles would fix that.
        psum = pl.pallas_call(
            functools.partial(_reduce_kernel, rem=rem1),
            out_shape=jax.ShapeDtypeStruct((N, C, 1), jnp.float32),
            grid=(N, n_l1),
            in_specs=[pl.BlockSpec((None, C, tile1), lambda n, l: (n, 0, l))],
            out_specs=pl.BlockSpec((None, C, 1), lambda n, l: (n, 0, 0)),
            scratch_shapes=[pltpu.VMEM((C, tile1), jnp.float32)],
            compiler_params=pltpu.CompilerParams(
                dimension_semantics=("parallel", "arbitrary"),
                vmem_limit_bytes=vmem_limit),
        )(x)
        # tiny (C,)-sized epilogue: mean, EMA update, bias shift (plain JAX)
        mean = jnp.sum(psum[:, :, 0], axis=0) * (1.0 / float(N * L))
        new_rm = rm_f32 * (1.0 - momentum) + mean * momentum
        shift = (mean - bias_f32).reshape(C, 1)
    else:
        new_rm = rm_f32
        shift = (rm_f32 - bias_f32).reshape(C, 1)

    # ---- phase 2: tiled broadcast subtract of the (C, 1) shift --------------
    # 6 streams (3 inputs + 3 outputs), each double-buffered
    bpl2 = 12 * c_pad_in * itemsize
    tile2 = _pick_lane_tile(L, bpl2, budget, outer=N, min_blocks=2,
                            max_tile=tile_cap)
    n_l2 = pl.cdiv(L, tile2)

    data_spec = pl.BlockSpec((None, C, tile2), lambda n, l: (n, 0, l))
    shift_spec = pl.BlockSpec((C, 1), lambda n, l: (0, 0))

    # TODO(synk): with donated inputs, input_output_aliases={0:0,1:1,2:2} would
    # reuse the x/lower/upper HBM buffers; without donation XLA inserts
    # defensive copies, so fresh outputs are returned instead.
    x_o, lo_o, up_o = pl.pallas_call(
        _subtract_kernel,
        out_shape=(jax.ShapeDtypeStruct((N, C, L), dtype),) * 3,
        grid=(N, n_l2),
        in_specs=[data_spec, data_spec, data_spec, shift_spec],
        out_specs=(data_spec,) * 3,
        compiler_params=pltpu.CompilerParams(
            dimension_semantics=("parallel", "parallel"),
            vmem_limit_bytes=vmem_limit),
    )(x, lower, upper, shift)

    return (x_o, lo_o, up_o), new_rm.astype(running_mean.dtype)


if __name__ == "__main__":
    key = jax.random.PRNGKey(0)
    momentum = 0.01

    def reference(x, lower, upper, running_mean, bias, training):
        xf = x.astype(jnp.float32)
        if training:
            mean = xf.mean(axis=(0, 2))
            rm = running_mean * (1 - momentum) + momentum * mean
        else:
            mean = running_mean
            rm = running_mean
        if bias is not None:
            mean = mean - bias
        shift = mean[None, :, None]
        sub = lambda z: (z.astype(jnp.float32) - shift).astype(z.dtype)
        return (sub(x), sub(lower), sub(upper)), rm

    def check(N, C, L, dtype, max_lane_tile=None, training=True, atol=1e-5):
        k1, k2, k3 = jax.random.split(
            jax.random.fold_in(key, N * 100000 + C * 1000 + L), 3)
        x = jax.random.normal(k1, (N, C, L), dtype=jnp.float32).astype(dtype)
        lower = jax.random.normal(k2, (N, C, L), dtype=jnp.float32).astype(dtype)
        upper = jax.random.normal(k3, (N, C, L), dtype=jnp.float32).astype(dtype)
        running_mean = 0.1 * jnp.arange(C, dtype=jnp.float32)
        bias = 0.05 * jnp.arange(C, dtype=jnp.float32)

        (x_c, lo_c, up_c), new_rm = mean_shift_forward(
            x, lower, upper, running_mean, bias,
            momentum=momentum, training=training, affine=True,
            max_lane_tile=max_lane_tile)
        jax.block_until_ready((x_c, lo_c, up_c, new_rm))

        (xr, lr, ur), rmr = reference(x, lower, upper, running_mean, bias,
                                      training)
        ok = (jnp.allclose(x_c.astype(jnp.float32), xr.astype(jnp.float32), atol=atol)
              and jnp.allclose(lo_c.astype(jnp.float32), lr.astype(jnp.float32), atol=atol)
              and jnp.allclose(up_c.astype(jnp.float32), ur.astype(jnp.float32), atol=atol)
              and jnp.allclose(new_rm, rmr, atol=1e-5))
        assert bool(ok), (
            f"Pallas MeanShift mismatch (N={N},C={C},L={L},{dtype},"
            f"tile={max_lane_tile},training={training})")

    # small module-sized shape: single full-width lane block per batch element
    check(2, 4, 16, jnp.float32)
    # multi-L-tile grid (even split across 2 lane tiles)
    check(2, 4, 512, jnp.float32, max_lane_tile=256)
    # ragged L (300 = 2*128 + 44): masked reduce tile + dropped OOB stores
    check(2, 4, 300, jnp.float32, max_lane_tile=128)
    # channel count that fills full f32 sublane rows
    check(2, 8, 384, jnp.float32, max_lane_tile=128)
    # bf16 inputs: f32 accumulation + explicit cast on store
    check(2, 4, 512, jnp.bfloat16, max_lane_tile=256, atol=2e-2)
    # eval mode: shift = running_mean - bias, no EMA update
    check(2, 4, 16, jnp.float32, training=False)

    print("KERNEL_OK")
</pallas_src>

<mosaic_0001>
module attributes {stable_mosaic.version = 11 : i64} {
  func.func @_reduce_kernel(%arg0: i32, %arg1: i32, %arg2: memref<1x4x16xf32, #tpu.memory_space<vmem>>, %arg3: memref<1x4x1xf32, #tpu.memory_space<vmem>>, %arg4: memref<4x16xf32, #tpu.memory_space<vmem>>) attributes {dimension_semantics = [#tpu.dimension_semantics<parallel>, #tpu.dimension_semantics<arbitrary>], iteration_bounds = array<i64: 2, 1>, scalar_prefetch = 0 : i64, scratch_operands = 1 : i64, tpu.core_type = #tpu.core_type<tc>, window_params = [{transform_indices = @transform_0, window_bounds = array<i64: 1, 4, 16>}, {transform_indices = @transform_1, window_bounds = array<i64: 1, 4, 1>}]} {
    %c0 = arith.constant 0 : index
    %c0_0 = arith.constant 0 : index
    %c0_1 = arith.constant 0 : index
    %0 = vector.load %arg2[%c0, %c0_0, %c0_1] : memref<1x4x16xf32, #tpu.memory_space<vmem>>, vector<1x4x16xf32>
    %1 = vector.shape_cast %0 : vector<1x4x16xf32> to vector<4x16xf32>
    %c0_i32 = arith.constant 0 : i32
    %2 = arith.cmpi eq, %arg1, %c0_i32 : i32
    %3 = arith.extui %2 : i1 to i32
    %c0_i32_2 = arith.constant 0 : i32
    %4 = arith.cmpi ne, %3, %c0_i32_2 : i32
    scf.if %4 {
      %cst = arith.constant 0.000000e+00 : f32
      %11 = vector.broadcast %cst : f32 to vector<4x16xf32>
      %c0_9 = arith.constant 0 : index
      %c0_10 = arith.constant 0 : index
      %12 = vector.load %arg4[%c0_9, %c0_10] : memref<4x16xf32, #tpu.memory_space<vmem>>, vector<4x16xf32>
      tpu.vector_store %arg4[%c0_9, %c0_10], %11 {strides = array<i32>} : memref<4x16xf32, #tpu.memory_space<vmem>>, vector<4x16xf32>,
    } else {
    }
    %c0_3 = arith.constant 0 : index
    %c0_4 = arith.constant 0 : index
    %5 = vector.load %arg4[%c0_3, %c0_4] : memref<4x16xf32, #tpu.memory_space<vmem>>, vector<4x16xf32>
    %6 = arith.addf %5, %1 : vector<4x16xf32>
    %c0_5 = arith.constant 0 : index
    %c0_6 = arith.constant 0 : index
    %7 = vector.load %arg4[%c0_5, %c0_6] : memref<4x16xf32, #tpu.memory_space<vmem>>, vector<4x16xf32>
    tpu.vector_store %arg4[%c0_5, %c0_6], %6 {strides = array<i32>} : memref<4x16xf32, #tpu.memory_space<vmem>>, vector<4x16xf32>,
    %c0_i32_7 = arith.constant 0 : i32
    %8 = arith.cmpi eq, %arg1, %c0_i32_7 : i32
    %9 = arith.extui %8 : i1 to i32
    %c0_i32_8 = arith.constant 0 : i32
    %10 = arith.cmpi ne, %9, %c0_i32_8 : i32
    scf.if %10 {
      %c0_9 = arith.constant 0 : index
      %c0_10 = arith.constant 0 : index
      %11 = vector.load %arg4[%c0_9, %c0_10] : memref<4x16xf32, #tpu.memory_space<vmem>>, vector<4x16xf32>
      %cst = arith.constant dense<0.000000e+00> : vector<4xf32>
      %12 = vector.multi_reduction <add>, %11, %cst [1] : vector<4x16xf32> to vector<4xf32>
      %13 = vector.shape_cast %12 : vector<4xf32> to vector<4x1xf32>
      %c0_11 = arith.constant 0 : index
      %c0_12 = arith.constant 0 : index
      %c0_13 = arith.constant 0 : index
      %14 = vector.load %arg3[%c0_11, %c0_12, %c0_13] : memref<1x4x1xf32, #tpu.memory_space<vmem>>, vector<1x4x1xf32>
      %15 = vector.shape_cast %14 : vector<1x4x1xf32> to vector<4x1xf32>
      %16 = vector.shape_cast %13 : vector<4x1xf32> to vector<1x4x1xf32>
      tpu.vector_store %arg3[%c0_11, %c0_12, %c0_13], %16 {strides = array<i32>} : memref<1x4x1xf32, #tpu.memory_space<vmem>>, vector<1x4x1xf32>,
    } else {
    }
    return
  }
  func.func @transform_0(%arg0: i32, %arg1: i32) -> (i32, i32, i32) {
    %c0_i32 = arith.constant 0 : i32
    %c0_i32_0 = arith.constant 0 : i32
    return %arg0, %c0_i32, %arg1 : i32, i32, i32
  }
  func.func @transform_1(%arg0: i32, %arg1: i32) -> (i32, i32, i32) {
    %c0_i32 = arith.constant 0 : i32
    %c0_i32_0 = arith.constant 0 : i32
    %c0_i32_1 = arith.constant 0 : i32
    return %arg0, %c0_i32, %c0_i32_0 : i32, i32, i32
  }
}

module attributes {stable_mosaic.version = 11 : i64} {
  func.func @_subtract_kernel(%arg0: i32, %arg1: i32, %arg2: memref<1x4x16xf32, #tpu.memory_space<vmem>>, %arg3: memref<1x4x16xf32, #tpu.memory_space<vmem>>, %arg4: memref<1x4x16xf32, #tpu.memory_space<vmem>>, %arg5: memref<4x1xf32, #tpu.memory_space<vmem>>, %arg6: memref<1x4x16xf32, #tpu.memory_space<vmem>>, %arg7: memref<1x4x16xf32, #tpu.memory_space<vmem>>, %arg8: memref<1x4x16xf32, #tpu.memory_space<vmem>>) attributes {dimension_semantics = [#tpu.dimension_semantics<parallel>, #tpu.dimension_semantics<parallel>], iteration_bounds = array<i64: 2, 1>, scalar_prefetch = 0 : i64, scratch_operands = 0 : i64, tpu.core_type = #tpu.core_type<tc>, window_params = [{transform_indices = @transform_0, window_bounds = array<i64: 1, 4, 16>}, {transform_indices = @transform_1, window_bounds = array<i64: 1, 4, 16>}, {transform_indices = @transform_2, window_bounds = array<i64: 1, 4, 16>}, {pipeline_mode = #tpu.pipeline_mode<synchronous>, transform_indices = @transform_3, window_bounds = array<i64: 4, 1>}, {transform_indices = @transform_4, window_bounds = array<i64: 1, 4, 16>}, {transform_indices = @transform_5, window_bounds = array<i64: 1, 4, 16>}, {transform_indices = @transform_6, window_bounds = array<i64: 1, 4, 16>}]} {
    %c0 = arith.constant 0 : index
    %c0_0 = arith.constant 0 : index
    %0 = vector.load %arg5[%c0, %c0_0] : memref<4x1xf32, #tpu.memory_space<vmem>>, vector<4x1xf32>
    %c0_1 = arith.constant 0 : index
    %c0_2 = arith.constant 0 : index
    %c0_3 = arith.constant 0 : index
    %1 = vector.load %arg2[%c0_1, %c0_2, %c0_3] : memref<1x4x16xf32, #tpu.memory_space<vmem>>, vector<1x4x16xf32>
    %2 = vector.shape_cast %1 : vector<1x4x16xf32> to vector<4x16xf32>
    %3 = vector.broadcast %0 : vector<4x1xf32> to vector<4x16xf32>
    %4 = arith.subf %2, %3 : vector<4x16xf32>
    %c0_4 = arith.constant 0 : index
    %c0_5 = arith.constant 0 : index
    %c0_6 = arith.constant 0 : index
    %5 = vector.load %arg6[%c0_4, %c0_5, %c0_6] : memref<1x4x16xf32, #tpu.memory_space<vmem>>, vector<1x4x16xf32>
    %6 = vector.shape_cast %5 : vector<1x4x16xf32> to vector<4x16xf32>
    %7 = vector.shape_cast %4 : vector<4x16xf32> to vector<1x4x16xf32>
    tpu.vector_store %arg6[%c0_4, %c0_5, %c0_6], %7 {strides = array<i32>} : memref<1x4x16xf32, #tpu.memory_space<vmem>>, vector<1x4x16xf32>,
    %c0_7 = arith.constant 0 : index
    %c0_8 = arith.constant 0 : index
    %c0_9 = arith.constant 0 : index
    %8 = vector.load %arg3[%c0_7, %c0_8, %c0_9] : memref<1x4x16xf32, #tpu.memory_space<vmem>>, vector<1x4x16xf32>
    %9 = vector.shape_cast %8 : vector<1x4x16xf32> to vector<4x16xf32>
    %10 = vector.broadcast %0 : vector<4x1xf32> to vector<4x16xf32>
    %11 = arith.subf %9, %10 : vector<4x16xf32>
    %c0_10 = arith.constant 0 : index
    %c0_11 = arith.constant 0 : index
    %c0_12 = arith.constant 0 : index
    %12 = vector.load %arg7[%c0_10, %c0_11, %c0_12] : memref<1x4x16xf32, #tpu.memory_space<vmem>>, vector<1x4x16xf32>
    %13 = vector.shape_cast %12 : vector<1x4x16xf32> to vector<4x16xf32>
    %14 = vector.shape_cast %11 : vector<4x16xf32> to vector<1x4x16xf32>
    tpu.vector_store %arg7[%c0_10, %c0_11, %c0_12], %14 {strides = array<i32>} : memref<1x4x16xf32, #tpu.memory_space<vmem>>, vector<1x4x16xf32>,
    %c0_13 = arith.constant 0 : index
    %c0_14 = arith.constant 0 : index
    %c0_15 = arith.constant 0 : index
    %15 = vector.load %arg4[%c0_13, %c0_14, %c0_15] : memref<1x4x16xf32, #tpu.memory_space<vmem>>, vector<1x4x16xf32>
    %16 = vector.shape_cast %15 : vector<1x4x16xf32> to vector<4x16xf32>
    %17 = vector.broadcast %0 : vector<4x1xf32> to vector<4x16xf32>
    %18 = arith.subf %16, %17 : vector<4x16xf32>
    %c0_16 = arith.constant 0 : index
    %c0_17 = arith.constant 0 : index
    %c0_18 = arith.constant 0 : index
    %19 = vector.load %arg8[%c0_16, %c0_17, %c0_18] : memref<1x4x16xf32, #tpu.memory_space<vmem>>, vector<1x4x16xf32>
    %20 = vector.shape_cast %19 : vector<1x4x16xf32> to vector<4x16xf32>
    %21 = vector.shape_cast %18 : vector<4x16xf32> to vector<1x4x16xf32>
    tpu.vector_store %arg8[%c0_16, %c0_17, %c0_18], %21 {strides = array<i32>} : memref<1x4x16xf32, #tpu.memory_space<vmem>>, vector<1x4x16xf32>,
    return
  }
  func.func @transform_0(%arg0: i32, %arg1: i32) -> (i32, i32, i32) {
    %c0_i32 = arith.constant 0 : i32
    %c0_i32_0 = arith.constant 0 : i32
    return %arg0, %c0_i32, %arg1 : i32, i32, i32
  }
  func.func @transform_1(%arg0: i32, %arg1: i32) -> (i32, i32, i32) {
    %c0_i32 = arith.constant 0 : i32
    %c0_i32_0 = arith.constant 0 : i32
    return %arg0, %c0_i32, %arg1 : i32, i32, i32
  }
  func.func @transform_2(%arg0: i32, %arg1: i32) -> (i32, i32, i32) {
    %c0_i32 = arith.constant 0 : i32
    %c0_i32_0 = arith.constant 0 : i32
    return %arg0, %c0_i32, %arg1 : i32, i32, i32
  }
  func.func @transform_3(%arg0: i32, %arg1: i32) -> (i32, i32) {
    %c0_i32 = arith.constant 0 : i32
    %c0_i32_0 = arith.constant 0 : i32
    %c0_i32_1 = arith.constant 0 : i32
    return %c0_i32, %c0_i32_0 : i32, i32
  }
  func.func @transform_4(%arg0: i32, %arg1: i32) -> (i32, i32, i32) {
    %c0_i32 = arith.constant 0 : i32
    %c0_i32_0 = arith.constant 0 : i32
    return %arg0, %c0_i32, %arg1 : i32, i32, i32
  }
  func.func @transform_5(%arg0: i32, %arg1: i32) -> (i32, i32, i32) {
    %c0_i32 = arith.constant 0 : i32
    %c0_i32_0 = arith.constant 0 : i32
    return %arg0, %c0_i32, %arg1 : i32, i32, i32
  }
  func.func @transform_6(%arg0: i32, %arg1: i32) -> (i32, i32, i32) {
    %c0_i32 = arith.constant 0 : i32
    %c0_i32_0 = arith.constant 0 : i32
    return %arg0, %c0_i32, %arg1 : i32, i32, i32
  }
}

</mosaic_0001>

<bundles_post_ra>
// kernel: mean_shift_forward.2
= control target key start
LH: loop header
LB: loop body
LE: loop exit
PB: predicated region body
PF: predicated region fallthrough
CT: control target
= control target key end

     0   :  { %s288_s6 = smov 0   ;;  %s290_s7 = smov 0   ;;  %s318_s0 = inlined_call_operand.vmem [shape: f32[2,4,16], index: 0, kind: input, shape index: {}]   ;;  %s319_s1 = inlined_call_operand.vmem [shape: f32[2,4,1], index: 1, kind: output, shape index: {}]  }
   0x1   :  { %s292_s8 = smov 0  }
   0x2 LB: > { %s23_s9 = sadd.s32 1, %s271_s7  ;;  %p223_p0 = scmp.ge.s32.totalorder %s275_s8, 1  ;;  %s275_s8 = sphi %s292_s8, %s11_s8   ;;  %s271_s7 = sphi %s290_s7, %s321_s7   ;;  %s267_s6 = sphi %s288_s6, %s320_s6  }
   0x3   : > { %p25_p1 = scmp.ge.s32.totalorder %s23_s9, 2  ;;  %p103_p2 = scmp.lt.s32.totalorder %s275_s8, 3 }
   0x5   : > { %s323_s9 = smov (%p25_p1, %s23_s9), 0  ;;  %p104_p3 = pnand %p223_p0, %p103_p2 }
   0x6   : > { %p124_p4 = scmp.lt.s32.totalorder (!%p104_p3), %s267_s6, 1  ;;  %vm140_vm0 = vcmask (!%p104_p3), 125952   ;;  %v277_v0 = vmov (!%p104_p3), 0.0   ;;  %vm153_vm1 = vcmask (!%p104_p3), 3072  }
   0x7   : > { %107 = sbr.rel (%p104_p3) target bundleno = 172 (0xac), region = 24  ;;  %141 = vst.msk [vmem:[#allocation2] sm:$0xf] (!%p104_p3), %vm140_vm0, %v277_v0 }
   0xe   : > { %s325_s6 = smov (!%p124_p4, %s267_s6), 1  ;;  %v142_v2 = vld [vmem:[#allocation2] sm:$0xf] }
   0xf   : > { %s224_s10 = sshll.u32 %s325_s6, 2 }
  0x10   : > { %s130_s13 = scalar_lea.vmem %s318_s0, %s224_s10  ;;  %s134_s16 = scalar_lea.vmem %s319_s1, %s224_s10 }
  0x11   : > { %v135_v1 = vld [vmem:[%s130_s13] sm:$0xf] }
  0x12   : > { %v143_v3 = vadd.f32 %v142_v2, %v135_v1 }
  0x14   : > { %145 = vst.msk [vmem:[#allocation2] sm:$0xf] %vm140_vm0, %v143_v3 }
  0x1b   : > { %v149_v4 = vld [vmem:[#allocation2] sm:$0xf] }
  0x1c   : > { %v150_v5 = vsel %vm140_vm0, %v149_v4, 0.0 }
  0x1d   : > { %151 = vadd.xlane.f32.xlu0 %v150_v5 }
  0xaa   : > { %v152_v6 = vpop.xlane.xlu0 %151 }
  0xab   : > { %154 = vst.msk [vmem:[%s134_s16] sm:$0xf] %vm153_vm1, %v152_v6 }
  0xac PF: > { %s11_s8 = sadd.s32 1, %s275_s8   ;;  %s320_s6 = smov %s271_s7 }
  0xad   : > { %p8_p5 = scmp.ge.s32.totalorder %s11_s8, 4   ;;  %s321_s7 = smov %s323_s9 }
  0xaf   :  { %10 = sbr.rel (!%p8_p5) target bundleno = 2 (0x2), region = 62 }

// kernel: mean_shift_forward.3
= control target key start
LH: loop header
LB: loop body
LE: loop exit
PB: predicated region body
PF: predicated region fallthrough
CT: control target
= control target key end

     0   :  { %s1044_s0 = inlined_call_operand.vmem [shape: f32[2,4,16], index: 0, kind: input, shape index: {}]   ;;  %s1045_s1 = inlined_call_operand.vmem [shape: f32[2,4,16], index: 1, kind: input, shape index: {}]   ;;  %s1046_s2 = inlined_call_operand.vmem [shape: f32[2,4,16], index: 2, kind: input, shape index: {}]   ;;  %s1047_s3 = inlined_call_operand.vmem [shape: f32[4,1], index: 3, kind: input, shape index: {}]   ;;  %s1048_s4 = inlined_call_operand.hbm [shape: f32[2,4,16], index: 4, kind: output, shape index: {0}]   ;;  %s1049_s5 = inlined_call_operand.hbm [shape: f32[2,4,16], index: 5, kind: output, shape index: {1}]   ;;  %s1050_s6 = inlined_call_operand.hbm [shape: f32[2,4,16], index: 6, kind: output, shape index: {2}]  }
   0x1   :  { %1055 = sst [smem:[#allocation11_spill]] %s1047_s3 }
   0x2   :  { %12 = vsyncpa [#allocation3], 0 }
   0x3   :  { %14 = vsyncpa [#allocation3 + $0x1], 0 }
   0x4   :  { %15 = vsyncpa [#allocation5], 0 }
   0x5   :  { %17 = vsyncpa [#allocation5 + $0x1], 0  ;;  %s848_s21 = smov 0   ;;  %s850_s22 = smov 0  }
   0x6   :  { %s852_s23 = smov 0   ;;  %s854_s24 = smov 0  }
   0x7   :  { %s856_s25 = smov 0   ;;  %s858_s26 = smov 0  }
   0x8 LB: > { %1056 = sst [smem:[#allocation9_spill]] %s803_s25  ;;  %s583_s27 = sadd.s32 4294967295, %s807_s26   ;;  %s807_s26 = sphi %s858_s26, %s23_s26   ;;  %s803_s25 = sphi %s856_s25, %s1064_s25   ;;  %s799_s24 = sphi %s854_s24, %s1063_s24   ;;  %s795_s23 = sphi %s852_s23, %s1067_s23   ;;  %s791_s22 = sphi %s850_s22, %s1066_s22   ;;  %s787_s21 = sphi %s848_s21, %s1065_s21  }
   0x9   : > { %s1051_s28 = sadd.s32 4294967294, %s807_s26   ;;  %s35_s29 = sadd.s32 1, %s803_s25 }
   0xa   : > { %s149_s30 = sadd.s32 1, %s795_s23  ;;  %p37_p0 = scmp.ge.s32.totalorder %s35_s29, 2 }
   0xb   : > { %p159_p1 = scmp.ne.s32.totalorder %s795_s23, %s791_s22  ;;  %p160_p2 = scmp.eq.s32.totalorder %s583_s27, 1 }
   0xc   : > { %p165_p3 = scmp.ne.s32.totalorder %s791_s22, %s787_s21  ;;  %s1069_s29 = smov (%p37_p0, %s35_s29), 0 }
   0xd   : > { %1057 = sst [smem:[#allocation10_spill]] %s1069_s29  ;;  %p890_p4 = por %p160_p2, %p159_p1 }
   0xe   : > { %p166_p5 = scmp.eq.s32.totalorder %s1051_s28, 1  ;;  %s144_s8 = ssub.s32 %s803_s25, %s1069_s29 }
   0xf   : > { %p587_p6 = scmp.ge.s32.totalorder %s807_s26, 1  ;;  %p147_p7 = scmp.eq.s32.totalorder %s144_s8, 0 }
  0x10   : > { %p899_p8 = por %p166_p5, %p165_p3  ;;  %p273_p9 = scmp.lt.s32.totalorder %s807_s26, 3 }
  0x11   : > { %s905_s10 = scalar_select %p147_p7, %s795_s23, %s149_s30  }
  0x12   : > { %p274_p10 = pnand %p587_p6, %p273_p9 }
  0x13   : > { %s1060_s3 = sld [smem:[#allocation11_spill]] (!%p274_p10)  ;;  %v809_v1 = vmov (!%p274_p10), 0   ;;  %p329_p11 = scmp.lt.s32.totalorder (!%p274_p10), %s799_s24, 1  ;;  %vm358_vm0 = vcmask (!%p274_p10), 125952  }
  0x14   : > { %277 = sbr.rel (%p274_p10) target bundleno = 217 (0xd9), region = 36  ;;  %668 = vset.pattern.permute.xlu0 (!%p274_p10), %v809_v1  ;;  %s1053_s14 = sand.u32 (!%p274_p10), 1, %s791_s22  }
  0x15   : > { %s588_s16 = sshll.u32 (!%p274_p10), %s1053_s14, 2  ;;  %s597_s29 = sshll.u32 (!%p274_p10), %s799_s24, 6 }
  0x16   : > { %s314_s25 = scalar_lea.vmem (!%p274_p10), [#allocation2], %s588_s16  ;;  %s932_s30 = scalar_lea.hbm (!%p274_p10), %s1049_s5, %s597_s29 }
  0x17   : > { %s391_s17 = sshll.u32 (!%p274_p10), %s314_s25, 4  ;;  %s946_s11 = scalar_lea.hbm (!%p274_p10), %s1050_s6, %s597_s29  ;;  %s941_s17 = int_to_ptr.vmem [resolvable:$true] %s391_s17 }
  0x18   : > { %s810_s20 = smov (!%p274_p10), [#allocation4]  }
  0x19   : > { %v350_v0 = vld [vmem:[%s1060_s3] sm:$0xf] (!%p274_p10)  ;;  %s926_s3 = sand.u32 (!%p274_p10), 1, %s583_s27  }
  0x1a   : > { %354 = vperm.xlu0 (!%p274_p10), %668, %v350_v0   ;;  %s372_s12 = scalar_lea.sflag (!%p274_p10), [#allocation5], %s926_s3 }
  0x1b   : > { %s330_s13 = scalar_select %p329_p11, %s799_s24, 1 }
  0x1c   : > { %s673_s24 = sshll.u32 %s810_s20, 4  ;;  %s674_s24 = int_to_ptr.vmem [resolvable:$false] %s673_s24 }
  0x1d   : > { %s591_s15 = sshll.u32 %s330_s13, 2  ;;  %s321_s13 = scalar_lea.vmem [#allocation4], %s588_s16 }
  0x1e   : > { %s335_s19 = scalar_lea.vmem %s1044_s0, %s591_s15  ;;  %s342_s8 = scalar_lea.vmem %s1045_s1, %s591_s15 }
  0x1f   : > { %s349_s28 = scalar_lea.vmem %s1046_s2, %s591_s15  ;;  %v351_v2 = vld [vmem:[%s335_s19] sm:$0xf]  ;;  %s405_s14 = sshll.u32 %s321_s13, 4  ;;  %s934_s14 = int_to_ptr.vmem [resolvable:$true] %s405_s14 }
  0x20   : > { %v360_v3 = vld [vmem:[%s342_s8] sm:$0xf]  ;;  %s328_s15 = scalar_lea.vmem [#allocation6], %s588_s16  ;;  %s939_s19 = scalar_lea.hbm %s1048_s4, %s597_s29 }
  0x21   : > { %v363_v4 = vld [vmem:[%s349_s28] sm:$0xf]  ;;  %s419_s27 = sshll.u32 %s328_s15, 4  ;;  %s669_s18 = scalar_lea.vmem %s934_s14, 64  ;;  %s948_s27 = int_to_ptr.vmem [resolvable:$true] %s419_s27 }
  0x22   : > { %p670_p12 = scmp.ne.s32.totalorder %s934_s14, %s669_s18  ;;  %s675_s28 = scalar_lea.vmem %s674_s24, 128 }
  0x23   : > { %p676_p1 = scmp.lt.s32.totalorder %s934_s14, %s674_s24  ;;  %p677_p2 = scmp.lt.s32.totalorder %s675_s28, %s669_s18 }
  0x24   : > { %p671_p13 = pnand %p670_p12, %p890_p4 }
  0x25   : > { %p678_p3 = por %p677_p2, %p676_p1 }
  0x26   : > { %p672_p0 = pneg %p671_p13 }
  0x28   : > { %p679_p5 = pnand %p678_p3, %p672_p0 }
  0x99   : > { %v355_v5 = vpop.permute.xlu0 %354 }
  0x9a   : > { %v357_v6 = vsub.f32 %v351_v2, %v355_v5  ;;  %v361_v7 = vsub.f32 %v360_v3, %v355_v5  ;;  %v364_v8 = vsub.f32 %v363_v4, %v355_v5 }
  0x9c   : > { %362 = vst.msk [vmem:[%s321_s13] sm:$0xf] %vm358_vm0, %v361_v7  ;;  %359 = vst.msk [vmem:[%s314_s25] sm:$0xf] %vm358_vm0, %v357_v6 }
  0x9d   : > { %365 = vst.msk [vmem:[%s328_s15] sm:$0xf] %vm358_vm0, %v364_v8 }
  0x9e   : > { %682 = shalt.err (!%p679_p5)
}
  0x9f   : > { %s683_s25 = scalar_lea.hbm %s932_s30, 64  ;;  %s687_s15 = scalar_lea.hbm %s1049_s5, 128 }
  0xa0   : > { %p684_p6 = scmp.ne.s32.totalorder %s932_s30, %s683_s25  ;;  %p688_p10 = scmp.lt.u32.totalorder %s932_s30, %s1049_s5 }
  0xa1   : > { %p689_p11 = scmp.lt.u32.totalorder %s687_s15, %s683_s25  ;;  %p691_p13 = scmp.lt.u32.totalorder %s683_s25, %s932_s30 }
  0xa2   : > { %p685_p7 = pnand %p684_p6, %p890_p4 }
  0xa3   : > { %p690_p12 = por %p689_p11, %p688_p10 }
  0xa4   : > { %p686_p9 = pneg %p685_p7 }
  0xa5   : > { %p692_p0 = por %p691_p13, %p690_p12 }
  0xa7   : > { %p693_p1 = pnand %p692_p0, %p686_p9 }
  0xa9   : > { %696 = shalt.err (!%p693_p1)
}
  0xaa   : > { %603 = dma.vmem_to_hbm [thread:$0]  (%p890_p4), %s934_s14, 64, %s932_s30, %s372_s12  }
  0xab   : > { %s1061_s18 = sand.u32 1, %s791_s22   ;;  %s697_s24 = scalar_lea.vmem %s941_s17, 64 }
  0xac   : > { %s367_s20 = scalar_lea.sflag [#allocation3], %s1061_s18  ;;  %p698_p2 = scmp.ne.s32.totalorder %s941_s17, %s697_s24 }
  0xad   : > { %s811_s28 = smov [#allocation2]  }
  0xae   : > { %p699_p3 = pnand %p698_p2, %p890_p4  ;;  %s701_s25 = sshll.u32 %s811_s28, 4  ;;  %s702_s25 = int_to_ptr.vmem [resolvable:$false] %s701_s25 }
  0xaf   : > { %s703_s29 = scalar_lea.vmem %s702_s25, 128  ;;  %p704_p6 = scmp.lt.s32.totalorder %s941_s17, %s702_s25 }
  0xb0   : > { %p700_p5 = pneg %p699_p3  ;;  %p705_p7 = scmp.lt.s32.totalorder %s703_s29, %s697_s24 }
  0xb2   : > { %p706_p9 = por %p705_p7, %p704_p6 }
  0xb4   : > { %p707_p10 = pnand %p706_p9, %p700_p5 }
  0xb6   : > { %710 = shalt.err (!%p707_p10)
}
  0xb7   : > { %s711_s14 = scalar_lea.hbm %s939_s19, 64  ;;  %s715_s15 = scalar_lea.hbm %s1048_s4, 128 }
  0xb8   : > { %p712_p11 = scmp.ne.s32.totalorder %s939_s19, %s711_s14  ;;  %p716_p0 = scmp.lt.u32.totalorder %s939_s19, %s1048_s4 }
  0xb9   : > { %p717_p1 = scmp.lt.u32.totalorder %s715_s15, %s711_s14  ;;  %p719_p3 = scmp.lt.u32.totalorder %s711_s14, %s939_s19 }
  0xba   : > { %p713_p12 = pnand %p712_p11, %p890_p4 }
  0xbb   : > { %p718_p2 = por %p717_p1, %p716_p0 }
  0xbc   : > { %p714_p13 = pneg %p713_p12 }
  0xbd   : > { %p720_p5 = por %p719_p3, %p718_p2 }
  0xbf   : > { %p721_p6 = pnand %p720_p5, %p714_p13 }
  0xc1   : > { %724 = shalt.err (!%p721_p6)
}
  0xc2   : > { %602 = dma.vmem_to_hbm [thread:$0]  (%p890_p4), %s941_s17, 64, %s939_s19, %s367_s20  }
  0xc3   : > { %s725_s18 = scalar_lea.vmem %s948_s27, 64  ;;  %s812_s24 = smov [#allocation6]  }
  0xc4   : > { %p726_p7 = scmp.ne.s32.totalorder %s948_s27, %s725_s18  ;;  %s729_s28 = sshll.u32 %s812_s24, 4  ;;  %s730_s28 = int_to_ptr.vmem [resolvable:$false] %s729_s28 }
  0xc5   : > { %s731_s25 = scalar_lea.vmem %s730_s28, 128  ;;  %p732_p11 = scmp.lt.s32.totalorder %s948_s27, %s730_s28 }
  0xc6   : > { %p727_p9 = pnand %p726_p7, %p890_p4  ;;  %p733_p12 = scmp.lt.s32.totalorder %s731_s25, %s725_s18 }
  0xc8   : > { %p728_p10 = pneg %p727_p9  ;;  %p734_p13 = por %p733_p12, %p732_p11 }
  0xca   : > { %p735_p0 = pnand %p734_p13, %p728_p10 }
  0xcc   : > { %738 = shalt.err (!%p735_p0)
}
  0xcd   : > { %s739_s17 = scalar_lea.hbm %s946_s11, 64  ;;  %s743_s29 = scalar_lea.hbm %s1050_s6, 128 }
  0xce   : > { %p740_p1 = scmp.ne.s32.totalorder %s946_s11, %s739_s17  ;;  %p744_p5 = scmp.lt.u32.totalorder %s946_s11, %s1050_s6 }
  0xcf   : > { %p745_p6 = scmp.lt.u32.totalorder %s743_s29, %s739_s17  ;;  %p747_p9 = scmp.lt.u32.totalorder %s739_s17, %s946_s11 }
  0xd0   : > { %p741_p2 = pnand %p740_p1, %p890_p4 }
  0xd1   : > { %p746_p7 = por %p745_p6, %p744_p5 }
  0xd2   : > { %p742_p3 = pneg %p741_p2 }
  0xd3   : > { %p748_p10 = por %p747_p9, %p746_p7 }
  0xd5   : > { %p749_p11 = pnand %p748_p10, %p742_p3 }
  0xd7   : > { %752 = shalt.err (!%p749_p11)
}
  0xd8   : > { %604 = dma.vmem_to_hbm [thread:$0]  (%p890_p4), %s948_s27, 64, %s946_s11, %s372_s12  }
  0xd9 PF: > { %p618_p12 = scmp.ge.s32.totalorder %s807_s26, 2  ;;  %s431_s13 = sand.u32 1, %s787_s21  }
  0xda   : > { %s432_s15 = scalar_lea.sflag [#allocation3], %s431_s13 }
  0xdb   : > { %p609_p13 = pnand %p618_p12, %p899_p8 }
  0xdd   : > { %778 = dma.done.wait (!%p609_p13), %s432_s15, 64  }
  0xde   : > { %780 = vsyncadd (!%p609_p13), %s432_s15, 4294967232  ;;  %s1062_s16 = sadd.s32 4294967294, %s807_s26  }
  0xdf   : > { %s440_s8 = sand.u32 1, %s1062_s16  }
  0xe0   : > { %s441_s7 = scalar_lea.sflag [#allocation5], %s440_s8 }
  0xe1   : > { %782 = dma.done.wait (!%p609_p13), %s441_s7, 128  }
  0xe2   : > { %784 = vsyncadd (!%p609_p13), %s441_s7, 4294967168  ;;  %s23_s26 = sadd.s32 1, %s807_s26   ;;  %s1063_s24 = sld [smem:[#allocation9_spill]] }
  0xe3   : > { %p20_p4 = scmp.ge.s32.totalorder %s23_s26, 4   ;;  %s1064_s25 = sld [smem:[#allocation10_spill]] }
  0xe4   : > { %s1065_s21 = smov %s791_s22  ;;  %s1066_s22 = smov %s795_s23 }
  0xe5   : > { %s1067_s23 = smov %s905_s10  ;;  %22 = sbr.rel (!%p20_p4) target bundleno = 8 (0x8), region = 109 }
  0xec   :  { %455 = vsyncpa [#allocation3], 1 }
  0xed   :  { %457 = vsyncpa [#allocation3 + $0x1], 1 }
  0xee   :  { %458 = vsyncpa [#allocation5], 1 }
  0xef   :  { %460 = vsyncpa [#allocation5 + $0x1], 1 }

</bundles_post_ra>
